<compile_context>
chip_gen: v6e
topology: v6e:2x2x1
jax: 0.10.0
libtpu: 0.0.40
codegen_flags: <defaults>
</compile_context>

<pallas_src>
import math

import numpy as np
import jax
import jax.numpy as jnp
from jax.experimental import pallas as pl
from jax.experimental.pallas import tpu as pltpu


def _build_pe(max_len: int, d_model: int) -> jnp.ndarray:
    """Deterministic sinusoidal positional-encoding table (max_len, d_model)."""
    position = jnp.arange(max_len, dtype=jnp.float32)[:, None]            # (L, 1)
    div_term = jnp.exp(
        jnp.arange(0, d_model, 2, dtype=jnp.float32)
        * -(math.log(10000.0) / d_model)
    )                                                                      # (D/2,)
    ang = position * div_term                                              # (L, D/2)
    # interleave: even cols = sin, odd cols = cos
    pe = jnp.stack([jnp.sin(ang), jnp.cos(ang)], axis=-1).reshape(max_len, d_model)
    return pe.astype(jnp.float32)


def _choose_tiles(B: int, T: int, D: int, target_bytes: int):
    """Pick (bB, tT) so one (bB, tT, D) f32 tile stays under target_bytes.

    tT is a multiple of 8 unless it covers the full sequence extent; there is
    NO requirement that tT divide T — partial edge blocks are handled by the
    pl.cdiv grid.  No fallback to a full (T, D) block (VMEM safety on v7x).
    """
    bytes_per_row = D * 4
    max_rows = max(8, target_bytes // bytes_per_row)
    if T <= max_rows:
        tT = T                                   # full sequence in one block
        bB = max(1, min(B, max_rows // max(T, 1)))  # fold batch into the block
    else:
        tT = (max_rows // 8) * 8                 # largest multiple of 8 in budget
        bB = 1
    return bB, tT


def _hash_u32(x):
    """splitmix32 / murmur3-fmix32 style avalanche on uint32 (cheap VPU ops)."""
    x = x ^ (x >> 16)
    x = x * np.uint32(0x7FEB352D)
    x = x ^ (x >> 15)
    x = x * np.uint32(0x846CA68B)
    x = x ^ (x >> 16)
    return x


def _make_kernel(dropout_p: float, *, B: int, T: int, D: int, bB: int, tT: int):
    apply_dropout = dropout_p > 0.0
    # numpy scalars -> embedded as jaxpr literals (NOT captured jax Arrays).
    thresh = np.uint32(min(int(dropout_p * 4294967296.0), 4294967295))
    inv_keep = (np.float32(1.0 / (1.0 - dropout_p))
                if dropout_p < 1.0 else np.float32(0.0))

    def kernel(seed_ref, x_ref, pe_ref, o_ref):
        # x_ref / o_ref: (bB, tT, D); pe_ref: (tT, D) broadcast over batch.
        y = x_ref[...] + pe_ref[...]
        if apply_dropout:
            t = pl.program_id(0)          # seq-tile index
            b = pl.program_id(1)          # batch-block index
            shape = y.shape
            bi = jax.lax.broadcasted_iota(jnp.int32, shape, 0) + b * bB
            ti = jax.lax.broadcasted_iota(jnp.int32, shape, 1) + t * tT
            di = jax.lax.broadcasted_iota(jnp.int32, shape, 2)
            # Globally-unique element id (mod 2**32) -> mask independent of
            # the chosen tiling / grid order.
            idx = (bi * T + ti) * D + di
            # Mix the user seed with a large odd constant so (seed, index)
            # pairs never collide the way `seed + linear_index` does.
            sd = seed_ref[0] * np.int32(-1640531527)      # seed * 0x9E3779B9 (wraps)
            bits = _hash_u32(jax.lax.bitcast_convert_type(idx ^ sd, jnp.uint32))
            keep = bits >= thresh                          # keep with prob 1-p
            y = jnp.where(keep, y * inv_keep, jnp.zeros_like(y))
        o_ref[...] = y.astype(o_ref.dtype)

    return kernel


def positional_encoding(x, pe_table, *, dropout_p: float = 0.1, seed: int = 0,
                        training: bool = True,
                        target_tile_bytes: int = 2 * 1024 * 1024,
                        donate_x: bool = False):
    """out = dropout(x + pe[:T]) — x: (B, T, D) float32.

    target_tile_bytes: per-(bB,tT,D) tile budget.  2 MiB is safe on every
    generation's default scoped-VMEM limit; raise to 4–8 MiB on v6e/v7x (the
    scoped limit is bumped automatically when needed).
    """
    B, T, D = x.shape
    pe_slice = pe_table[:T, :]                                             # (T, D)
    p = float(dropout_p) if training else 0.0
    seed_arr = jnp.array([seed], dtype=jnp.int32)

    bB, tT = _choose_tiles(B, T, D, target_tile_bytes)
    num_t = pl.cdiv(T, tT)
    num_b = pl.cdiv(B, bB)

    # Scoped-VMEM actually used: double-buffered x-in, out and PE tiles.
    tile_bytes = bB * tT * D * 4
    vmem_needed = 2 * (2 * tile_bytes + tT * D * 4)
    cp_kwargs = dict(dimension_semantics=("parallel", "parallel"))
    if vmem_needed > 12 * 1024 * 1024:
        # Larger-than-default tiles were requested (v6e/v7x): raise the limit.
        cp_kwargs["vmem_limit_bytes"] = int(vmem_needed * 5 // 4)

    call_kwargs = {}
    if donate_x:
        # x is flat input index 1 (after the scalar-prefetch seed); aliasing it
        # with the output removes one (B,T,D) HBM allocation when x is dead.
        call_kwargs["input_output_aliases"] = {1: 0}

    return pl.pallas_call(
        _make_kernel(p, B=B, T=T, D=D, bB=bB, tT=tT),
        out_shape=jax.ShapeDtypeStruct((B, T, D), x.dtype),
        grid_spec=pltpu.PrefetchScalarGridSpec(
            num_scalar_prefetch=1,
            # (seq-tile, batch-block) with batch innermost: the PE block index
            # only depends on the seq-tile index, so its re-DMA is skipped on
            # consecutive batch steps.
            grid=(num_t, num_b),
            in_specs=[
                pl.BlockSpec((bB, tT, D), lambda t, b, seed: (b, t, 0)),
                pl.BlockSpec((tT, D), lambda t, b, seed: (t, 0)),
            ],
            out_specs=pl.BlockSpec((bB, tT, D), lambda t, b, seed: (b, t, 0)),
        ),
        compiler_params=pltpu.CompilerParams(**cp_kwargs),
        **call_kwargs,
    )(seed_arr, x, pe_slice)


if __name__ == "__main__":
    B, T, D = 2, 16, 128       # D multiple of 128 -> lane-dense output stores
    MAX_LEN = 64
    DROPOUT_P = 0.1

    key = jax.random.PRNGKey(0)
    x = jax.random.normal(key, (B, T, D), dtype=jnp.float32)
    pe_table = _build_pe(MAX_LEN, D)
    ref = x + pe_table[None, :T, :]

    # 1) Deterministic check (dropout disabled, i.e. eval-mode forward).
    out_eval = jax.block_until_ready(
        positional_encoding(x, pe_table, dropout_p=DROPOUT_P, training=False))
    assert out_eval.shape == (B, T, D)
    assert jnp.allclose(out_eval, ref, atol=1e-6), "eval-mode mismatch"

    # 2) Training-mode forward with in-kernel dropout (stochastic mask).
    out_train = jax.block_until_ready(
        positional_encoding(x, pe_table, dropout_p=DROPOUT_P, seed=1234,
                            training=True))
    # Dropped elements are exactly 0; kept elements = ref / (1-p).
    # (An element whose true value is exactly 0 would be misclassified as
    #  dropped — a test artifact, not a kernel bug.)
    kept = out_train != 0.0
    assert jnp.allclose(
        jnp.where(kept, out_train, 0.0),
        jnp.where(kept, ref / (1.0 - DROPOUT_P), 0.0),
        atol=1e-5,
    ), "train-mode dropout scaling mismatch"
    drop_frac = 1.0 - jnp.mean(kept.astype(jnp.float32))
    assert 0.0 < drop_frac < 0.5, "dropout mask looks degenerate"

    print("KERNEL_OK")
</pallas_src>

<mosaic_0001>
module attributes {stable_mosaic.version = 11 : i64} {
  func.func @kernel(%arg0: i32, %arg1: i32, %arg2: memref<1xi32, #tpu.memory_space<smem>>, %arg3: memref<2x16x128xf32, #tpu.memory_space<vmem>>, %arg4: memref<16x128xf32, #tpu.memory_space<vmem>>, %arg5: memref<2x16x128xf32, #tpu.memory_space<vmem>>) attributes {dimension_semantics = [#tpu.dimension_semantics<parallel>, #tpu.dimension_semantics<parallel>], iteration_bounds = array<i64: 1, 1>, scalar_prefetch = 1 : i64, scratch_operands = 0 : i64, tpu.core_type = #tpu.core_type<tc>, window_params = [{transform_indices = @transform_0, window_bounds = array<i64: 2, 16, 128>}, {transform_indices = @transform_1, window_bounds = array<i64: 16, 128>}, {transform_indices = @transform_2, window_bounds = array<i64: 2, 16, 128>}]} {
    %c0 = arith.constant 0 : index
    %c0_0 = arith.constant 0 : index
    %c0_1 = arith.constant 0 : index
    %0 = vector.load %arg3[%c0, %c0_0, %c0_1] : memref<2x16x128xf32, #tpu.memory_space<vmem>>, vector<2x16x128xf32>
    %c0_2 = arith.constant 0 : index
    %c0_3 = arith.constant 0 : index
    %1 = vector.load %arg4[%c0_2, %c0_3] : memref<16x128xf32, #tpu.memory_space<vmem>>, vector<16x128xf32>
    %2 = vector.shape_cast %1 : vector<16x128xf32> to vector<1x16x128xf32>
    %3 = vector.broadcast %2 : vector<1x16x128xf32> to vector<2x16x128xf32>
    %4 = arith.addf %0, %3 : vector<2x16x128xf32>
    %c0_4 = arith.constant 0 : index
    %c0_5 = arith.constant 0 : index
    %c0_6 = arith.constant 0 : index
    %5 = vector.load %arg5[%c0_4, %c0_5, %c0_6] : memref<2x16x128xf32, #tpu.memory_space<vmem>>, vector<2x16x128xf32>
    tpu.vector_store %arg5[%c0_4, %c0_5, %c0_6], %4 {strides = array<i32>} : memref<2x16x128xf32, #tpu.memory_space<vmem>>, vector<2x16x128xf32>,
    return
  }
  func.func @transform_0(%arg0: i32, %arg1: i32, %arg2: memref<1xi32, #tpu.memory_space<smem>>) -> (i32, i32, i32) {
    %c0_i32 = arith.constant 0 : i32
    %c0_i32_0 = arith.constant 0 : i32
    return %arg1, %arg0, %c0_i32 : i32, i32, i32
  }
  func.func @transform_1(%arg0: i32, %arg1: i32, %arg2: memref<1xi32, #tpu.memory_space<smem>>) -> (i32, i32) {
    %c0_i32 = arith.constant 0 : i32
    %c0_i32_0 = arith.constant 0 : i32
    return %arg0, %c0_i32 : i32, i32
  }
  func.func @transform_2(%arg0: i32, %arg1: i32, %arg2: memref<1xi32, #tpu.memory_space<smem>>) -> (i32, i32, i32) {
    %c0_i32 = arith.constant 0 : i32
    %c0_i32_0 = arith.constant 0 : i32
    return %arg1, %arg0, %c0_i32 : i32, i32, i32
  }
}

</mosaic_0001>

<bundles_post_ra>
// kernel: tpu_custom_call.1
= control target key start
LH: loop header
LB: loop body
LE: loop exit
PB: predicated region body
PF: predicated region fallthrough
CT: control target
= control target key end

     0   :  { %9 = vsyncpa [#allocation5], 0  ;;  %s188_s0 = inlined_call_operand.<no memory space> [shape: s32[1], index: 0, kind: input, shape index: {}]   ;;  %s189_s1 = inlined_call_operand.hbm [shape: f32[2,16,128], index: 1, kind: input, shape index: {}]   ;;  %s190_s2 = inlined_call_operand.hbm [shape: f32[16,128], index: 2, kind: input, shape index: {}]   ;;  %s191_s3 = inlined_call_operand.hbm [shape: f32[2,16,128], index: 3, kind: output, shape index: {}]  }
   0x1   :  { %10 = vsyncpa [#allocation8], 0 }
   0x2   :  { %11 = vsyncpa [#allocation6], 0  ;;  %s145_s12 = smov [#allocation4]  }
   0x3   :  { %s17_s13 = sshll.u32 %s145_s12, 4  ;;  %s18_s13 = int_to_ptr.vmem [resolvable:$true] %s17_s13 }
   0x4   :  { %s87_s14 = scalar_lea.vmem %s18_s13, 512  ;;  %p92_p1 = scmp.lt.s32.totalorder %s18_s13, %s18_s13 }
   0x5   :  { %p88_p0 = scmp.ne.s32.totalorder %s18_s13, %s87_s14  ;;  %p93_p2 = scmp.lt.s32.totalorder %s87_s14, %s87_s14 }
   0x7   :  { %p94_p3 = por %p93_p2, %p92_p1 }
   0x9   :  { %p95_p4 = pnand %p94_p3, %p88_p0 }
   0xb   :  { %98 = shalt.err (!%p95_p4)
}
   0xc   :  { %s146_s0 = smov 128   ;;  %s147_s15 = smov 8  }
   0xd   :  { %23 = dma.hbm_to_vmem [thread:$0]  %s189_s1, 512, %s18_s13, [#allocation5], %s146_s0, %s146_s0, %s147_s15  }
   0xe   :  { %s148_s18 = smov [#allocation7]  }
   0xf   :  { %s29_s19 = sshll.u32 %s148_s18, 4  ;;  %s30_s19 = int_to_ptr.vmem [resolvable:$true] %s29_s19 }
  0x10   :  { %s107_s20 = scalar_lea.vmem %s30_s19, 256  ;;  %p112_p6 = scmp.lt.s32.totalorder %s30_s19, %s30_s19 }
  0x11   :  { %p108_p5 = scmp.ne.s32.totalorder %s30_s19, %s107_s20  ;;  %p113_p7 = scmp.lt.s32.totalorder %s107_s20, %s107_s20 }
  0x13   :  { %p114_p8 = por %p113_p7, %p112_p6 }
  0x15   :  { %p115_p9 = pnand %p114_p8, %p108_p5 }
  0x17   :  { %118 = shalt.err (!%p115_p9)
}
  0x18   :  { %35 = dma.hbm_to_vmem [thread:$0]  %s190_s2, 256, %s30_s19, [#allocation8], %s146_s0, %s146_s0, %s147_s15  }
  0x19   :  { %139 = dma.done.wait [#allocation5], 512  }
  0x1a   :  { %140 = vsyncadd [#allocation5], 4294966784 }
  0x1b   :  { %141 = dma.done.wait [#allocation8], 256  }
  0x1c   :  { %142 = vsyncadd [#allocation8], 4294967040  ;;  %s149_s1 = smov [#allocation9]   ;;  %v42_v0 = vld [vmem:[#allocation4] sm:$0xff]  ;;  %v43_v2 = vld [vmem:[#allocation4 + $0x8] sm:$0xff] }
  0x1d   :  { %s61_s23 = sshll.u32 %s149_s1, 4  ;;  %v46_v1 = vld [vmem:[#allocation7] sm:$0xff]  ;;  %v47_v4 = vld [vmem:[#allocation7 + $0x8] sm:$0xff]  ;;  %v44_v5 = vld [vmem:[#allocation4 + $0x10] sm:$0xff]  ;;  %s62_s23 = int_to_ptr.vmem [resolvable:$true] %s61_s23 }
  0x1e   :  { %v48_v3 = vadd.f32 %v46_v1, %v42_v0  ;;  %v45_v6 = vld [vmem:[#allocation4 + $0x18] sm:$0xff]  ;;  %v49_v7 = vadd.f32 %v47_v4, %v43_v2  ;;  %v50_v8 = vadd.f32 %v46_v1, %v44_v5  ;;  %s119_s2 = scalar_lea.vmem %s62_s23, 512  ;;  %p124_p11 = scmp.lt.s32.totalorder %s62_s23, %s62_s23 }
  0x1f   :  { %v51_v9 = vadd.f32 %v47_v4, %v45_v6  ;;  %p120_p10 = scmp.ne.s32.totalorder %s62_s23, %s119_s2  ;;  %p125_p12 = scmp.lt.s32.totalorder %s119_s2, %s119_s2 }
  0x20   :  { %52 = vst [vmem:[#allocation9] sm:$0xff] %v48_v3  ;;  %53 = vst [vmem:[#allocation9 + $0x8] sm:$0xff] %v49_v7 }
  0x21   :  { %54 = vst [vmem:[#allocation9 + $0x10] sm:$0xff] %v50_v8  ;;  %55 = vst [vmem:[#allocation9 + $0x18] sm:$0xff] %v51_v9  ;;  %p126_p13 = por %p125_p12, %p124_p11 }
  0x23   :  { %p127_p0 = pnand %p126_p13, %p120_p10 }
  0x25   :  { %130 = shalt.err (!%p127_p0)
}
  0x26   :  { %67 = dma.vmem_to_hbm [thread:$0]  %s62_s23, 512, %s191_s3, [#allocation6], %s146_s0, %s146_s0, %s147_s15  }
  0x27   :  { %143 = dma.done.wait [#allocation6], 512  }
  0x28   :  { %144 = vsyncadd [#allocation6], 4294966784 }
  0x29   :  { %71 = vsyncpa [#allocation5], 1 }
  0x2a   :  { %72 = vsyncpa [#allocation8], 1 }
  0x2b   :  { %73 = vsyncpa [#allocation6], 1 }

</bundles_post_ra>
